<compile_context>
chip_gen: v5e
topology: v5e:2x2
jax: 0.10.0
libtpu: 0.0.40
codegen_flags: <defaults>
</compile_context>

<pallas_src>
import functools
import math

import jax
import jax.numpy as jnp
from jax.experimental import pallas as pl
from jax.experimental.pallas import tpu as pltpu


def _gelu(x):
    # tanh-approximate GELU (EUP-friendly).  PyTorch nn.GELU defaults to the
    # exact erf form; the frozen original_mlp here is synthetic, so the tanh
    # approximation is used consistently in kernel and reference.
    return 0.5 * x * (1.0 + jnp.tanh(0.7978845608028654 * (x + 0.044715 * x * x * x)))


def _round_up(n, m):
    return ((n + m - 1) // m) * m


def _pad_to(a, shape):
    pads = [(0, t - s) for s, t in zip(a.shape, shape)]
    if all(p == (0, 0) for p in pads):
        return a
    return jnp.pad(a, pads)


def _vmem_budget_bytes():
    """Generation-aware usable VMEM budget (bytes)."""
    cap = 128 * (1 << 20)
    try:
        cap = int(getattr(pltpu.get_tpu_info(), "vmem_capacity_bytes", cap))
    except Exception:       # query unavailable -> assume 128 MiB (v5e/v6e)
        pass
    # Headroom for Mosaic internal scratch / semaphores / constants:
    # ~115 MiB on v5e/v6e (128 MiB physical), ~56 MiB on v7x (64 MiB physical).
    return max(24 * (1 << 20), min(cap - (8 << 20), int(cap * 0.9)))


def _invariant_spec(shape, index_map, single_buffer):
    """BlockSpec for a grid-invariant operand; single-buffer it if supported."""
    if single_buffer and hasattr(pl, "Buffered"):
        try:
            return pl.BlockSpec(shape, index_map, pipeline_mode=pl.Buffered(1))
        except Exception:
            pass
    return pl.BlockSpec(shape, index_map)


# --------------------------------------------------------------------------
# Kernels
# --------------------------------------------------------------------------

def _adaptmlp_resident_kernel(x_ref, wd_ref, bd_ref, wu_ref, bu_ref,
                              w1_ref, b1_ref, w2_ref, b2_ref, o_ref, *, scale):
    """All weights VMEM-resident; one grid axis over row tiles."""
    f32 = jnp.float32
    cdt = w1_ref.dtype                       # MXU operand dtype (bf16)
    xc = x_ref[...]                          # already bf16 (cast in the wrapper)

    # ---- AdaptFormer adapter branch ----
    down = jnp.dot(xc, wd_ref[...], preferred_element_type=f32) + bd_ref[...].astype(f32)
    down = jnp.maximum(down, 0.0)            # nn.ReLU
    # nn.Dropout(p=0.0) is the identity (module default / eval semantics).
    # TODO(synk): add pltpu.prng_seed/prng_random_bits masking for training-mode dropout (p>0).
    up = jnp.dot(down.astype(cdt), wu_ref[...], preferred_element_type=f32) \
        + bu_ref[...].astype(f32)

    # ---- frozen original MLP: GELU(x @ W1 + b1) @ W2 + b2 ----
    h = _gelu(jnp.dot(xc, w1_ref[...], preferred_element_type=f32)
              + b1_ref[...].astype(f32))
    mlp = jnp.dot(h.astype(cdt), w2_ref[...], preferred_element_type=f32) \
        + b2_ref[...].astype(f32)

    o_ref[...] = (mlp + up * scale).astype(o_ref.dtype)


def _adaptmlp_ktiled_kernel(x_ref, wd_ref, bd_ref, wu_ref, bu_ref,
                            w1_ref, b1_ref, w2_ref, b2_ref, o_ref, acc_ref, *, scale):
    """Fallback for very large frozen MLPs: hid dim tiled on a reduction axis."""
    k = pl.program_id(1)
    f32 = jnp.float32
    cdt = w1_ref.dtype
    xc = x_ref[...]                          # bf16, resident over the k axis

    # Adapter branch + fc2 bias: once per row tile (k == 0).
    @pl.when(k == 0)
    def _():
        down = jnp.dot(xc, wd_ref[...], preferred_element_type=f32) + bd_ref[...].astype(f32)
        down = jnp.maximum(down, 0.0)        # nn.ReLU; Dropout(p=0.0) == identity
        up = jnp.dot(down.astype(cdt), wu_ref[...], preferred_element_type=f32) \
            + bu_ref[...].astype(f32)
        acc_ref[...] = up * scale + b2_ref[...].astype(f32)

    # Frozen MLP branch, tiled over the hidden dim (reduction axis).
    h = _gelu(jnp.dot(xc, w1_ref[...], preferred_element_type=f32)
              + b1_ref[...].astype(f32))
    acc_ref[...] += jnp.dot(h.astype(cdt), w2_ref[...], preferred_element_type=f32)

    @pl.when(k == pl.num_programs(1) - 1)
    def _():
        o_ref[...] = acc_ref[...].astype(o_ref.dtype)


# --------------------------------------------------------------------------
# Wrapper
# --------------------------------------------------------------------------

def adapt_mlp_forward(x, params, *, scale=0.1, tm=None, th=None, force_path=None):
    """x: (B, N, in_dim). Returns (B, N, in_dim) in x.dtype.

    force_path: None (auto), "resident", or "ktiled" (testing / huge models).
    """
    B, N, D = x.shape
    wd, bd, wu, bu, w1, b1, w2, b2 = params
    mid, hid = wd.shape[1], w1.shape[1]
    cdt = w1.dtype                                      # bf16 MXU operand dtype
    w_e = jnp.dtype(cdt).itemsize
    out_dtype = x.dtype
    out_e = jnp.dtype(out_dtype).itemsize

    M = B * N
    Dp, midp, hidp = (_round_up(v, 128) for v in (D, mid, hid))

    budget = _vmem_budget_bytes()

    adapter_bytes = (Dp * midp + midp + midp * Dp + Dp + Dp) * w_e      # wd,bd,wu,bu,b2
    mlp_bytes = (Dp * hidp + hidp + hidp * Dp) * w_e                    # w1,b1,w2

    def row_tile(target):
        return max(8, min(_round_up(int(target), 8), _round_up(M, 8)))

    def resident_footprint(t):
        # Conservative: weights counted double-buffered (the Buffered(1) request
        # may be unavailable), plus double-buffered x/out tiles and f32 temps.
        io = 2 * t * Dp * (w_e + out_e)
        interm = t * (hidp + midp + 3 * Dp) * 4
        return 2 * (adapter_bytes + mlp_bytes) + io + interm

    def ktiled_footprint(t, tk):
        stream = (Dp * tk + tk + tk * Dp) * w_e
        io = 2 * t * Dp * (w_e + out_e)
        interm = t * (tk + midp + 2 * Dp) * 4
        return 2 * (adapter_bytes + stream) + io + t * Dp * 4 + interm

    # ---- choose path + tile sizes ----
    use_resident = force_path != "ktiled"
    tm_eff = th_eff = None
    if use_resident:
        cands = (tm,) if tm is not None else (512, 384, 256, 128)
        for cand in cands:
            t = row_tile(cand)
            if force_path == "resident" or resident_footprint(t) <= budget:
                tm_eff = t
                break
        if tm_eff is None:
            use_resident = False

    if not use_resident:
        tm_eff = row_tile(tm if tm is not None else 768)   # >= v6e/v7x roofline knee
        th_eff = max(128, min(_round_up(int(th or 1024), 128), hidp))
        while hidp % th_eff:
            th_eff -= 128
        while th_eff > 128 and ktiled_footprint(tm_eff, th_eff) > budget:
            th_eff -= 128
            while hidp % th_eff:
                th_eff -= 128
        while tm_eff > 64 and ktiled_footprint(tm_eff, th_eff) > budget:
            tm_eff = max(8, _round_up(tm_eff // 2, 8))

    Mp = _round_up(M, tm_eff)

    # ---- pad operands (lane-dense: features -> 128, rows -> tm_eff) ----
    x2 = _pad_to(x.reshape(M, D).astype(cdt), (Mp, Dp))      # bf16 x on wrapper side
    wd_p = _pad_to(wd.astype(cdt), (Dp, midp)); bd_p = _pad_to(bd.astype(cdt), (1, midp))
    wu_p = _pad_to(wu.astype(cdt), (midp, Dp)); bu_p = _pad_to(bu.astype(cdt), (1, Dp))
    w1_p = _pad_to(w1.astype(cdt), (Dp, hidp)); b1_p = _pad_to(b1.astype(cdt), (1, hidp))
    w2_p = _pad_to(w2.astype(cdt), (hidp, Dp)); b2_p = _pad_to(b2.astype(cdt), (1, Dp))

    # ---- cost estimate + generation-aware VMEM limit ----
    flops = int(2 * Mp * (2 * Dp * midp + 2 * Dp * hidp))
    if use_resident:
        w_traffic = adapter_bytes + mlp_bytes
        footprint = resident_footprint(tm_eff)
    else:
        w_traffic = adapter_bytes + (Mp // tm_eff) * mlp_bytes
        footprint = ktiled_footprint(tm_eff, th_eff)
    bytes_accessed = int(Mp * Dp * w_e + w_traffic + Mp * Dp * out_e)
    cost = pl.CostEstimate(flops=flops, transcendentals=int(Mp * hidp),
                           bytes_accessed=bytes_accessed)
    vmem_limit = int(min(budget, max(32 << 20, footprint + (16 << 20))))

    def _run(single_buffer):
        inv = lambda shape, imap: _invariant_spec(shape, imap, single_buffer)
        if use_resident:
            grid = (Mp // tm_eff,)
            in_specs = [
                pl.BlockSpec((tm_eff, Dp), lambda i: (i, 0)),            # x row tile
                inv((Dp, midp), lambda i: (0, 0)), inv((1, midp), lambda i: (0, 0)),
                inv((midp, Dp), lambda i: (0, 0)), inv((1, Dp), lambda i: (0, 0)),
                inv((Dp, hidp), lambda i: (0, 0)), inv((1, hidp), lambda i: (0, 0)),
                inv((hidp, Dp), lambda i: (0, 0)), inv((1, Dp), lambda i: (0, 0)),
            ]
            out_specs = pl.BlockSpec((tm_eff, Dp), lambda i: (i, 0))
            scratch = ()
            kern = functools.partial(_adaptmlp_resident_kernel, scale=scale)
            dims = ("parallel",)
        else:
            grid = (Mp // tm_eff, hidp // th_eff)
            in_specs = [
                pl.BlockSpec((tm_eff, Dp), lambda i, k: (i, 0)),         # x (resident over k)
                inv((Dp, midp), lambda i, k: (0, 0)), inv((1, midp), lambda i, k: (0, 0)),
                inv((midp, Dp), lambda i, k: (0, 0)), inv((1, Dp), lambda i, k: (0, 0)),
                pl.BlockSpec((Dp, th_eff), lambda i, k: (0, k)),         # W1 hid-tile
                pl.BlockSpec((1, th_eff), lambda i, k: (0, k)),          # b1 hid-tile
                pl.BlockSpec((th_eff, Dp), lambda i, k: (k, 0)),         # W2 hid-tile
                inv((1, Dp), lambda i, k: (0, 0)),                       # b2
            ]
            out_specs = pl.BlockSpec((tm_eff, Dp), lambda i, k: (i, 0))
            scratch = (pltpu.VMEM((tm_eff, Dp), jnp.float32),)
            kern = functools.partial(_adaptmlp_ktiled_kernel, scale=scale)
            dims = ("parallel", "arbitrary")

        out2 = pl.pallas_call(
            kern,
            out_shape=jax.ShapeDtypeStruct((Mp, Dp), out_dtype),
            grid=grid,
            in_specs=in_specs,
            out_specs=out_specs,
            scratch_shapes=scratch,
            compiler_params=pltpu.CompilerParams(
                dimension_semantics=dims, vmem_limit_bytes=vmem_limit),
            cost_estimate=cost,
        )(x2, wd_p, bd_p, wu_p, bu_p, w1_p, b1_p, w2_p, b2_p)
        return jax.block_until_ready(out2)

    try:
        out2 = _run(single_buffer=True)       # single-buffer invariant weights
    except Exception:
        out2 = _run(single_buffer=False)      # fall back to default double-buffering

    return out2[:M, :D].reshape(B, N, D)


# --------------------------------------------------------------------------
# Parameters / reference
# --------------------------------------------------------------------------

def make_params(key, in_dim, mid_dim, hidden_dim, param_dtype=jnp.bfloat16):
    k_down, k_w1, k_b1, k_w2, k_b2 = jax.random.split(key, 5)

    # down_proj: nn.init.kaiming_uniform_ (fan_in=in_dim, gain=sqrt(2)) -> bound=sqrt(6/fan_in)
    bound = math.sqrt(6.0 / in_dim)
    wd = jax.random.uniform(k_down, (in_dim, mid_dim), jnp.float32, -bound, bound)
    bd = jnp.zeros((1, mid_dim), jnp.float32)            # nn.init.zeros_
    wu = jnp.zeros((mid_dim, in_dim), jnp.float32)       # nn.init.zeros_
    bu = jnp.zeros((1, in_dim), jnp.float32)

    # frozen original_mlp (synthetic deterministic values; standard ViT MLP)
    w1 = 0.05 * jax.random.normal(k_w1, (in_dim, hidden_dim), jnp.float32)
    b1 = 0.05 * jax.random.normal(k_b1, (1, hidden_dim), jnp.float32)
    w2 = 0.05 * jax.random.normal(k_w2, (hidden_dim, in_dim), jnp.float32)
    b2 = 0.05 * jax.random.normal(k_b2, (1, in_dim), jnp.float32)

    return tuple(a.astype(param_dtype) for a in (wd, bd, wu, bu, w1, b1, w2, b2))


def reference_forward(x, params, scale=0.1):
    # Mirrors the kernel's numerics: bf16 MXU operands, f32 accumulation/elementwise.
    wd, bd, wu, bu, w1, b1, w2, b2 = params
    cdt = w1.dtype
    f32 = jnp.float32
    xc = x.astype(cdt)
    down = jnp.dot(xc, wd, preferred_element_type=f32) + bd.astype(f32)
    down = jnp.maximum(down, 0.0)
    up = jnp.dot(down.astype(cdt), wu, preferred_element_type=f32) + bu.astype(f32)
    h = jnp.dot(xc, w1, preferred_element_type=f32) + b1.astype(f32)
    mlp = jnp.dot(_gelu(h).astype(cdt), w2, preferred_element_type=f32) + b2.astype(f32)
    return mlp + up * scale


if __name__ == "__main__":
    B, N, IN_DIM, MID_DIM = 2, 8, 32, 16
    HIDDEN = 4 * IN_DIM          # standard ViT MLP expansion for the frozen branch
    SCALE = 0.1

    key = jax.random.PRNGKey(0)
    k_x, k_p = jax.random.split(key)
    x = jax.random.normal(k_x, (B, N, IN_DIM), jnp.float32)
    params = make_params(k_p, IN_DIM, MID_DIM, HIDDEN, param_dtype=jnp.bfloat16)

    ref = reference_forward(x.reshape(B * N, IN_DIM), params, SCALE).reshape(B, N, IN_DIM)

    # Default (weights VMEM-resident) path.
    out = adapt_mlp_forward(x, params, scale=SCALE)
    out = jax.block_until_ready(out)
    assert out.shape == (B, N, IN_DIM)
    assert out.dtype == x.dtype
    assert jnp.allclose(out, ref, atol=5e-3, rtol=5e-3), "resident path mismatch vs reference"

    # Exercise the hid-tiled fallback path too (used when the frozen MLP
    # doesn't fit the generation's VMEM budget).
    out_kt = adapt_mlp_forward(x, params, scale=SCALE, force_path="ktiled")
    out_kt = jax.block_until_ready(out_kt)
    assert jnp.allclose(out_kt, ref, atol=5e-3, rtol=5e-3), "k-tiled path mismatch vs reference"

    print("KERNEL_OK")
</pallas_src>

<mosaic_0001>
module attributes {stable_mosaic.version = 11 : i64} {
  func.func @_adaptmlp_resident_kernel(%arg0: i32, %arg1: memref<16x128xbf16, #tpu.memory_space<vmem>>, %arg2: memref<128x128xbf16, #tpu.memory_space<vmem>>, %arg3: memref<1x128xbf16, #tpu.memory_space<vmem>>, %arg4: memref<128x128xbf16, #tpu.memory_space<vmem>>, %arg5: memref<1x128xbf16, #tpu.memory_space<vmem>>, %arg6: memref<128x128xbf16, #tpu.memory_space<vmem>>, %arg7: memref<1x128xbf16, #tpu.memory_space<vmem>>, %arg8: memref<128x128xbf16, #tpu.memory_space<vmem>>, %arg9: memref<1x128xbf16, #tpu.memory_space<vmem>>, %arg10: memref<16x128xf32, #tpu.memory_space<vmem>>) attributes {dimension_semantics = [#tpu.dimension_semantics<parallel>], iteration_bounds = array<i64: 1>, scalar_prefetch = 0 : i64, scratch_operands = 0 : i64, tpu.core_type = #tpu.core_type<tc>, window_params = [{transform_indices = @transform_0, window_bounds = array<i64: 16, 128>}, {pipeline_mode = #tpu.pipeline_mode<synchronous>, transform_indices = @transform_1, window_bounds = array<i64: 128, 128>}, {pipeline_mode = #tpu.pipeline_mode<synchronous>, transform_indices = @transform_2, window_bounds = array<i64: 1, 128>}, {pipeline_mode = #tpu.pipeline_mode<synchronous>, transform_indices = @transform_3, window_bounds = array<i64: 128, 128>}, {pipeline_mode = #tpu.pipeline_mode<synchronous>, transform_indices = @transform_4, window_bounds = array<i64: 1, 128>}, {pipeline_mode = #tpu.pipeline_mode<synchronous>, transform_indices = @transform_5, window_bounds = array<i64: 128, 128>}, {pipeline_mode = #tpu.pipeline_mode<synchronous>, transform_indices = @transform_6, window_bounds = array<i64: 1, 128>}, {pipeline_mode = #tpu.pipeline_mode<synchronous>, transform_indices = @transform_7, window_bounds = array<i64: 128, 128>}, {pipeline_mode = #tpu.pipeline_mode<synchronous>, transform_indices = @transform_8, window_bounds = array<i64: 1, 128>}, {transform_indices = @transform_9, window_bounds = array<i64: 16, 128>}]} {
    %c0 = arith.constant 0 : index
    %c0_0 = arith.constant 0 : index
    %0 = vector.load %arg1[%c0, %c0_0] : memref<16x128xbf16, #tpu.memory_space<vmem>>, vector<16x128xbf16>
    %c0_1 = arith.constant 0 : index
    %c0_2 = arith.constant 0 : index
    %1 = vector.load %arg2[%c0_1, %c0_2] : memref<128x128xbf16, #tpu.memory_space<vmem>>, vector<128x128xbf16>
    %cst = arith.constant dense<0.000000e+00> : vector<16x128xf32>
    %2 = tpu.matmul %0, %1, %cst {dimension_numbers = #tpu.dot_dimension_numbers<[1], [0], [0], [1], [0, 0, 1, 1], [], []>} : vector<16x128xbf16>, vector<128x128xbf16>, vector<16x128xf32> -> vector<16x128xf32>
    %c0_3 = arith.constant 0 : index
    %c0_4 = arith.constant 0 : index
    %3 = vector.load %arg3[%c0_3, %c0_4] : memref<1x128xbf16, #tpu.memory_space<vmem>>, vector<1x128xbf16>
    %4 = arith.extf %3 : vector<1x128xbf16> to vector<1x128xf32>
    %5 = vector.broadcast %4 : vector<1x128xf32> to vector<16x128xf32>
    %6 = arith.addf %2, %5 : vector<16x128xf32>
    %cst_5 = arith.constant 0.000000e+00 : f32
    %7 = vector.broadcast %cst_5 : f32 to vector<16x128xf32>
    %8 = arith.maximumf %6, %7 : vector<16x128xf32>
    %9 = arith.truncf %8 : vector<16x128xf32> to vector<16x128xbf16>
    %c0_6 = arith.constant 0 : index
    %c0_7 = arith.constant 0 : index
    %10 = vector.load %arg4[%c0_6, %c0_7] : memref<128x128xbf16, #tpu.memory_space<vmem>>, vector<128x128xbf16>
    %cst_8 = arith.constant dense<0.000000e+00> : vector<16x128xf32>
    %11 = tpu.matmul %9, %10, %cst_8 {dimension_numbers = #tpu.dot_dimension_numbers<[1], [0], [0], [1], [0, 0, 1, 1], [], []>} : vector<16x128xbf16>, vector<128x128xbf16>, vector<16x128xf32> -> vector<16x128xf32>
    %c0_9 = arith.constant 0 : index
    %c0_10 = arith.constant 0 : index
    %12 = vector.load %arg5[%c0_9, %c0_10] : memref<1x128xbf16, #tpu.memory_space<vmem>>, vector<1x128xbf16>
    %13 = arith.extf %12 : vector<1x128xbf16> to vector<1x128xf32>
    %14 = vector.broadcast %13 : vector<1x128xf32> to vector<16x128xf32>
    %15 = arith.addf %11, %14 : vector<16x128xf32>
    %c0_11 = arith.constant 0 : index
    %c0_12 = arith.constant 0 : index
    %16 = vector.load %arg6[%c0_11, %c0_12] : memref<128x128xbf16, #tpu.memory_space<vmem>>, vector<128x128xbf16>
    %cst_13 = arith.constant dense<0.000000e+00> : vector<16x128xf32>
    %17 = tpu.matmul %0, %16, %cst_13 {dimension_numbers = #tpu.dot_dimension_numbers<[1], [0], [0], [1], [0, 0, 1, 1], [], []>} : vector<16x128xbf16>, vector<128x128xbf16>, vector<16x128xf32> -> vector<16x128xf32>
    %c0_14 = arith.constant 0 : index
    %c0_15 = arith.constant 0 : index
    %18 = vector.load %arg7[%c0_14, %c0_15] : memref<1x128xbf16, #tpu.memory_space<vmem>>, vector<1x128xbf16>
    %19 = arith.extf %18 : vector<1x128xbf16> to vector<1x128xf32>
    %20 = vector.broadcast %19 : vector<1x128xf32> to vector<16x128xf32>
    %21 = arith.addf %17, %20 : vector<16x128xf32>
    %cst_16 = arith.constant 5.000000e-01 : f32
    %22 = vector.broadcast %cst_16 : f32 to vector<16x128xf32>
    %23 = arith.mulf %22, %21 : vector<16x128xf32>
    %cst_17 = arith.constant 4.471500e-02 : f32
    %24 = vector.broadcast %cst_17 : f32 to vector<16x128xf32>
    %25 = arith.mulf %24, %21 : vector<16x128xf32>
    %26 = arith.mulf %25, %21 : vector<16x128xf32>
    %27 = arith.mulf %26, %21 : vector<16x128xf32>
    %28 = arith.addf %21, %27 : vector<16x128xf32>
    %cst_18 = arith.constant 0.797884583 : f32
    %29 = vector.broadcast %cst_18 : f32 to vector<16x128xf32>
    %30 = arith.mulf %29, %28 : vector<16x128xf32>
    %31 = math.tanh %30 : vector<16x128xf32>
    %cst_19 = arith.constant 1.000000e+00 : f32
    %32 = vector.broadcast %cst_19 : f32 to vector<16x128xf32>
    %33 = arith.addf %32, %31 : vector<16x128xf32>
    %34 = arith.mulf %23, %33 : vector<16x128xf32>
    %35 = arith.truncf %34 : vector<16x128xf32> to vector<16x128xbf16>
    %c0_20 = arith.constant 0 : index
    %c0_21 = arith.constant 0 : index
    %36 = vector.load %arg8[%c0_20, %c0_21] : memref<128x128xbf16, #tpu.memory_space<vmem>>, vector<128x128xbf16>
    %cst_22 = arith.constant dense<0.000000e+00> : vector<16x128xf32>
    %37 = tpu.matmul %35, %36, %cst_22 {dimension_numbers = #tpu.dot_dimension_numbers<[1], [0], [0], [1], [0, 0, 1, 1], [], []>} : vector<16x128xbf16>, vector<128x128xbf16>, vector<16x128xf32> -> vector<16x128xf32>
    %c0_23 = arith.constant 0 : index
    %c0_24 = arith.constant 0 : index
    %38 = vector.load %arg9[%c0_23, %c0_24] : memref<1x128xbf16, #tpu.memory_space<vmem>>, vector<1x128xbf16>
    %39 = arith.extf %38 : vector<1x128xbf16> to vector<1x128xf32>
    %40 = vector.broadcast %39 : vector<1x128xf32> to vector<16x128xf32>
    %41 = arith.addf %37, %40 : vector<16x128xf32>
    %cst_25 = arith.constant 1.000000e-01 : f32
    %42 = vector.broadcast %cst_25 : f32 to vector<16x128xf32>
    %43 = arith.mulf %15, %42 : vector<16x128xf32>
    %44 = arith.addf %41, %43 : vector<16x128xf32>
    %c0_26 = arith.constant 0 : index
    %c0_27 = arith.constant 0 : index
    %45 = vector.load %arg10[%c0_26, %c0_27] : memref<16x128xf32, #tpu.memory_space<vmem>>, vector<16x128xf32>
    tpu.vector_store %arg10[%c0_26, %c0_27], %44 {strides = array<i32>} : memref<16x128xf32, #tpu.memory_space<vmem>>, vector<16x128xf32>,
    return
  }
  func.func @transform_0(%arg0: i32) -> (i32, i32) {
    %c0_i32 = arith.constant 0 : i32
    %c0_i32_0 = arith.constant 0 : i32
    return %arg0, %c0_i32 : i32, i32
  }
  func.func @transform_1(%arg0: i32) -> (i32, i32) {
    %c0_i32 = arith.constant 0 : i32
    %c0_i32_0 = arith.constant 0 : i32
    %c0_i32_1 = arith.constant 0 : i32
    return %c0_i32, %c0_i32_0 : i32, i32
  }
  func.func @transform_2(%arg0: i32) -> (i32, i32) {
    %c0_i32 = arith.constant 0 : i32
    %c0_i32_0 = arith.constant 0 : i32
    %c0_i32_1 = arith.constant 0 : i32
    return %c0_i32, %c0_i32_0 : i32, i32
  }
  func.func @transform_3(%arg0: i32) -> (i32, i32) {
    %c0_i32 = arith.constant 0 : i32
    %c0_i32_0 = arith.constant 0 : i32
    %c0_i32_1 = arith.constant 0 : i32
    return %c0_i32, %c0_i32_0 : i32, i32
  }
  func.func @transform_4(%arg0: i32) -> (i32, i32) {
    %c0_i32 = arith.constant 0 : i32
    %c0_i32_0 = arith.constant 0 : i32
    %c0_i32_1 = arith.constant 0 : i32
    return %c0_i32, %c0_i32_0 : i32, i32
  }
  func.func @transform_5(%arg0: i32) -> (i32, i32) {
    %c0_i32 = arith.constant 0 : i32
    %c0_i32_0 = arith.constant 0 : i32
    %c0_i32_1 = arith.constant 0 : i32
    return %c0_i32, %c0_i32_0 : i32, i32
  }
  func.func @transform_6(%arg0: i32) -> (i32, i32) {
    %c0_i32 = arith.constant 0 : i32
    %c0_i32_0 = arith.constant 0 : i32
    %c0_i32_1 = arith.constant 0 : i32
    return %c0_i32, %c0_i32_0 : i32, i32
  }
  func.func @transform_7(%arg0: i32) -> (i32, i32) {
    %c0_i32 = arith.constant 0 : i32
    %c0_i32_0 = arith.constant 0 : i32
    %c0_i32_1 = arith.constant 0 : i32
    return %c0_i32, %c0_i32_0 : i32, i32
  }
  func.func @transform_8(%arg0: i32) -> (i32, i32) {
    %c0_i32 = arith.constant 0 : i32
    %c0_i32_0 = arith.constant 0 : i32
    %c0_i32_1 = arith.constant 0 : i32
    return %c0_i32, %c0_i32_0 : i32, i32
  }
  func.func @transform_9(%arg0: i32) -> (i32, i32) {
    %c0_i32 = arith.constant 0 : i32
    %c0_i32_0 = arith.constant 0 : i32
    return %arg0, %c0_i32 : i32, i32
  }
}

module attributes {stable_mosaic.version = 11 : i64} {
  func.func @_adaptmlp_resident_kernel(%arg0: i32, %arg1: memref<16x128xbf16, #tpu.memory_space<vmem>>, %arg2: memref<128x128xbf16, #tpu.memory_space<vmem>>, %arg3: memref<1x128xbf16, #tpu.memory_space<vmem>>, %arg4: memref<128x128xbf16, #tpu.memory_space<vmem>>, %arg5: memref<1x128xbf16, #tpu.memory_space<vmem>>, %arg6: memref<128x128xbf16, #tpu.memory_space<vmem>>, %arg7: memref<1x128xbf16, #tpu.memory_space<vmem>>, %arg8: memref<128x128xbf16, #tpu.memory_space<vmem>>, %arg9: memref<1x128xbf16, #tpu.memory_space<vmem>>, %arg10: memref<16x128xf32, #tpu.memory_space<vmem>>) attributes {dimension_semantics = [#tpu.dimension_semantics<parallel>], iteration_bounds = array<i64: 1>, scalar_prefetch = 0 : i64, scratch_operands = 0 : i64, tpu.core_type = #tpu.core_type<tc>, window_params = [{transform_indices = @transform_0, window_bounds = array<i64: 16, 128>}, {pipeline_mode = #tpu.pipeline_mode<synchronous>, transform_indices = @transform_1, window_bounds = array<i64: 128, 128>}, {pipeline_mode = #tpu.pipeline_mode<synchronous>, transform_indices = @transform_2, window_bounds = array<i64: 1, 128>}, {pipeline_mode = #tpu.pipeline_mode<synchronous>, transform_indices = @transform_3, window_bounds = array<i64: 128, 128>}, {pipeline_mode = #tpu.pipeline_mode<synchronous>, transform_indices = @transform_4, window_bounds = array<i64: 1, 128>}, {pipeline_mode = #tpu.pipeline_mode<synchronous>, transform_indices = @transform_5, window_bounds = array<i64: 128, 128>}, {pipeline_mode = #tpu.pipeline_mode<synchronous>, transform_indices = @transform_6, window_bounds = array<i64: 1, 128>}, {pipeline_mode = #tpu.pipeline_mode<synchronous>, transform_indices = @transform_7, window_bounds = array<i64: 128, 128>}, {pipeline_mode = #tpu.pipeline_mode<synchronous>, transform_indices = @transform_8, window_bounds = array<i64: 1, 128>}, {transform_indices = @transform_9, window_bounds = array<i64: 16, 128>}]} {
    %c0 = arith.constant 0 : index
    %c0_0 = arith.constant 0 : index
    %0 = vector.load %arg1[%c0, %c0_0] : memref<16x128xbf16, #tpu.memory_space<vmem>>, vector<16x128xbf16>
    %c0_1 = arith.constant 0 : index
    %c0_2 = arith.constant 0 : index
    %1 = vector.load %arg2[%c0_1, %c0_2] : memref<128x128xbf16, #tpu.memory_space<vmem>>, vector<128x128xbf16>
    %cst = arith.constant dense<0.000000e+00> : vector<16x128xf32>
    %2 = tpu.matmul %0, %1, %cst {dimension_numbers = #tpu.dot_dimension_numbers<[1], [0], [0], [1], [0, 0, 1, 1], [], []>} : vector<16x128xbf16>, vector<128x128xbf16>, vector<16x128xf32> -> vector<16x128xf32>
    %c0_3 = arith.constant 0 : index
    %c0_4 = arith.constant 0 : index
    %3 = vector.load %arg3[%c0_3, %c0_4] : memref<1x128xbf16, #tpu.memory_space<vmem>>, vector<1x128xbf16>
    %4 = arith.extf %3 : vector<1x128xbf16> to vector<1x128xf32>
    %5 = vector.broadcast %4 : vector<1x128xf32> to vector<16x128xf32>
    %6 = arith.addf %2, %5 : vector<16x128xf32>
    %cst_5 = arith.constant 0.000000e+00 : f32
    %7 = vector.broadcast %cst_5 : f32 to vector<16x128xf32>
    %8 = arith.maximumf %6, %7 : vector<16x128xf32>
    %9 = arith.truncf %8 : vector<16x128xf32> to vector<16x128xbf16>
    %c0_6 = arith.constant 0 : index
    %c0_7 = arith.constant 0 : index
    %10 = vector.load %arg4[%c0_6, %c0_7] : memref<128x128xbf16, #tpu.memory_space<vmem>>, vector<128x128xbf16>
    %cst_8 = arith.constant dense<0.000000e+00> : vector<16x128xf32>
    %11 = tpu.matmul %9, %10, %cst_8 {dimension_numbers = #tpu.dot_dimension_numbers<[1], [0], [0], [1], [0, 0, 1, 1], [], []>} : vector<16x128xbf16>, vector<128x128xbf16>, vector<16x128xf32> -> vector<16x128xf32>
    %c0_9 = arith.constant 0 : index
    %c0_10 = arith.constant 0 : index
    %12 = vector.load %arg5[%c0_9, %c0_10] : memref<1x128xbf16, #tpu.memory_space<vmem>>, vector<1x128xbf16>
    %13 = arith.extf %12 : vector<1x128xbf16> to vector<1x128xf32>
    %14 = vector.broadcast %13 : vector<1x128xf32> to vector<16x128xf32>
    %15 = arith.addf %11, %14 : vector<16x128xf32>
    %c0_11 = arith.constant 0 : index
    %c0_12 = arith.constant 0 : index
    %16 = vector.load %arg6[%c0_11, %c0_12] : memref<128x128xbf16, #tpu.memory_space<vmem>>, vector<128x128xbf16>
    %cst_13 = arith.constant dense<0.000000e+00> : vector<16x128xf32>
    %17 = tpu.matmul %0, %16, %cst_13 {dimension_numbers = #tpu.dot_dimension_numbers<[1], [0], [0], [1], [0, 0, 1, 1], [], []>} : vector<16x128xbf16>, vector<128x128xbf16>, vector<16x128xf32> -> vector<16x128xf32>
    %c0_14 = arith.constant 0 : index
    %c0_15 = arith.constant 0 : index
    %18 = vector.load %arg7[%c0_14, %c0_15] : memref<1x128xbf16, #tpu.memory_space<vmem>>, vector<1x128xbf16>
    %19 = arith.extf %18 : vector<1x128xbf16> to vector<1x128xf32>
    %20 = vector.broadcast %19 : vector<1x128xf32> to vector<16x128xf32>
    %21 = arith.addf %17, %20 : vector<16x128xf32>
    %cst_16 = arith.constant 5.000000e-01 : f32
    %22 = vector.broadcast %cst_16 : f32 to vector<16x128xf32>
    %23 = arith.mulf %22, %21 : vector<16x128xf32>
    %cst_17 = arith.constant 4.471500e-02 : f32
    %24 = vector.broadcast %cst_17 : f32 to vector<16x128xf32>
    %25 = arith.mulf %24, %21 : vector<16x128xf32>
    %26 = arith.mulf %25, %21 : vector<16x128xf32>
    %27 = arith.mulf %26, %21 : vector<16x128xf32>
    %28 = arith.addf %21, %27 : vector<16x128xf32>
    %cst_18 = arith.constant 0.797884583 : f32
    %29 = vector.broadcast %cst_18 : f32 to vector<16x128xf32>
    %30 = arith.mulf %29, %28 : vector<16x128xf32>
    %31 = math.tanh %30 : vector<16x128xf32>
    %cst_19 = arith.constant 1.000000e+00 : f32
    %32 = vector.broadcast %cst_19 : f32 to vector<16x128xf32>
    %33 = arith.addf %32, %31 : vector<16x128xf32>
    %34 = arith.mulf %23, %33 : vector<16x128xf32>
    %35 = arith.truncf %34 : vector<16x128xf32> to vector<16x128xbf16>
    %c0_20 = arith.constant 0 : index
    %c0_21 = arith.constant 0 : index
    %36 = vector.load %arg8[%c0_20, %c0_21] : memref<128x128xbf16, #tpu.memory_space<vmem>>, vector<128x128xbf16>
    %cst_22 = arith.constant dense<0.000000e+00> : vector<16x128xf32>
    %37 = tpu.matmul %35, %36, %cst_22 {dimension_numbers = #tpu.dot_dimension_numbers<[1], [0], [0], [1], [0, 0, 1, 1], [], []>} : vector<16x128xbf16>, vector<128x128xbf16>, vector<16x128xf32> -> vector<16x128xf32>
    %c0_23 = arith.constant 0 : index
    %c0_24 = arith.constant 0 : index
    %38 = vector.load %arg9[%c0_23, %c0_24] : memref<1x128xbf16, #tpu.memory_space<vmem>>, vector<1x128xbf16>
    %39 = arith.extf %38 : vector<1x128xbf16> to vector<1x128xf32>
    %40 = vector.broadcast %39 : vector<1x128xf32> to vector<16x128xf32>
    %41 = arith.addf %37, %40 : vector<16x128xf32>
    %cst_25 = arith.constant 1.000000e-01 : f32
    %42 = vector.broadcast %cst_25 : f32 to vector<16x128xf32>
    %43 = arith.mulf %15, %42 : vector<16x128xf32>
    %44 = arith.addf %41, %43 : vector<16x128xf32>
    %c0_26 = arith.constant 0 : index
    %c0_27 = arith.constant 0 : index
    %45 = vector.load %arg10[%c0_26, %c0_27] : memref<16x128xf32, #tpu.memory_space<vmem>>, vector<16x128xf32>
    tpu.vector_store %arg10[%c0_26, %c0_27], %44 {strides = array<i32>} : memref<16x128xf32, #tpu.memory_space<vmem>>, vector<16x128xf32>,
    return
  }
  func.func @transform_0(%arg0: i32) -> (i32, i32) {
    %c0_i32 = arith.constant 0 : i32
    %c0_i32_0 = arith.constant 0 : i32
    return %arg0, %c0_i32 : i32, i32
  }
  func.func @transform_1(%arg0: i32) -> (i32, i32) {
    %c0_i32 = arith.constant 0 : i32
    %c0_i32_0 = arith.constant 0 : i32
    %c0_i32_1 = arith.constant 0 : i32
    return %c0_i32, %c0_i32_0 : i32, i32
  }
  func.func @transform_2(%arg0: i32) -> (i32, i32) {
    %c0_i32 = arith.constant 0 : i32
    %c0_i32_0 = arith.constant 0 : i32
    %c0_i32_1 = arith.constant 0 : i32
    return %c0_i32, %c0_i32_0 : i32, i32
  }
  func.func @transform_3(%arg0: i32) -> (i32, i32) {
    %c0_i32 = arith.constant 0 : i32
    %c0_i32_0 = arith.constant 0 : i32
    %c0_i32_1 = arith.constant 0 : i32
    return %c0_i32, %c0_i32_0 : i32, i32
  }
  func.func @transform_4(%arg0: i32) -> (i32, i32) {
    %c0_i32 = arith.constant 0 : i32
    %c0_i32_0 = arith.constant 0 : i32
    %c0_i32_1 = arith.constant 0 : i32
    return %c0_i32, %c0_i32_0 : i32, i32
  }
  func.func @transform_5(%arg0: i32) -> (i32, i32) {
    %c0_i32 = arith.constant 0 : i32
    %c0_i32_0 = arith.constant 0 : i32
    %c0_i32_1 = arith.constant 0 : i32
    return %c0_i32, %c0_i32_0 : i32, i32
  }
  func.func @transform_6(%arg0: i32) -> (i32, i32) {
    %c0_i32 = arith.constant 0 : i32
    %c0_i32_0 = arith.constant 0 : i32
    %c0_i32_1 = arith.constant 0 : i32
    return %c0_i32, %c0_i32_0 : i32, i32
  }
  func.func @transform_7(%arg0: i32) -> (i32, i32) {
    %c0_i32 = arith.constant 0 : i32
    %c0_i32_0 = arith.constant 0 : i32
    %c0_i32_1 = arith.constant 0 : i32
    return %c0_i32, %c0_i32_0 : i32, i32
  }
  func.func @transform_8(%arg0: i32) -> (i32, i32) {
    %c0_i32 = arith.constant 0 : i32
    %c0_i32_0 = arith.constant 0 : i32
    %c0_i32_1 = arith.constant 0 : i32
    return %c0_i32, %c0_i32_0 : i32, i32
  }
  func.func @transform_9(%arg0: i32) -> (i32, i32) {
    %c0_i32 = arith.constant 0 : i32
    %c0_i32_0 = arith.constant 0 : i32
    return %arg0, %c0_i32 : i32, i32
  }
}

</mosaic_0001>

<bundles_post_ra>
// kernel: tpu_custom_call.1
= control target key start
LH: loop header
LB: loop body
LE: loop exit
PB: predicated region body
PF: predicated region fallthrough
CT: control target
= control target key end

     0   :  { %14 = vsyncpa [#allocation3], 0  ;;  %s913_s0 = inlined_call_operand.hbm [shape: bf16[16,128], index: 0, kind: input, shape index: {}]   ;;  %s914_s1 = inlined_call_operand.hbm [shape: bf16[128,128], index: 1, kind: input, shape index: {}]   ;;  %s915_s2 = inlined_call_operand.vmem [shape: bf16[1,128], index: 2, kind: input, shape index: {}]   ;;  %s916_s3 = inlined_call_operand.hbm [shape: bf16[128,128], index: 3, kind: input, shape index: {}]   ;;  %s917_s4 = inlined_call_operand.vmem [shape: bf16[1,128], index: 4, kind: input, shape index: {}]   ;;  %s918_s5 = inlined_call_operand.hbm [shape: bf16[128,128], index: 5, kind: input, shape index: {}]   ;;  %s919_s6 = inlined_call_operand.vmem [shape: bf16[1,128], index: 6, kind: input, shape index: {}]   ;;  %s920_s7 = inlined_call_operand.hbm [shape: bf16[128,128], index: 7, kind: input, shape index: {}]   ;;  %s921_s8 = inlined_call_operand.vmem [shape: bf16[1,128], index: 8, kind: input, shape index: {}]   ;;  %s922_s9 = inlined_call_operand.hbm [shape: f32[16,128], index: 9, kind: output, shape index: {}]  }
   0x1   :  { %15 = vsyncpa [#allocation6], 0 }
   0x2   :  { %16 = vsyncpa [#allocation9], 0 }
   0x3   :  { %17 = vsyncpa [#allocation4], 0  ;;  %s35_s11 = sshll.u32 %s914_s1, 4  ;;  %s823_s12 = smov [#allocation5]   ;;  %s36_s11 = int_to_ptr.hbm [resolvable:$true] %s35_s11 }
   0x4   :  { %s37_s13 = sshll.u32 %s823_s12, 4  ;;  %s65_s16 = sshll.u32 %s918_s5, 4  ;;  %s38_s13 = int_to_ptr.vmem [resolvable:$true] %s37_s13  ;;  %s66_s16 = int_to_ptr.hbm [resolvable:$true] %s65_s16 }
   0x5   :  { %s824_s17 = smov 64   ;;  %s825_s18 = smov 4  }
   0x6   :  { %43 = dma.hbm_to_vmem [thread:$0]  %s36_s11, 1024, %s38_s13, [#allocation6], %s824_s17, %s824_s17, %s825_s18  }
   0x7   :  { %s826_s19 = smov [#allocation8]   ;;  %s22_s23 = sshll.u32 %s913_s0, 4  ;;  %s23_s23 = int_to_ptr.hbm [resolvable:$true] %s22_s23 }
   0x8   :  { %s67_s20 = sshll.u32 %s826_s19, 4  ;;  %s50_s25 = sshll.u32 %s916_s3, 4  ;;  %s68_s20 = int_to_ptr.vmem [resolvable:$true] %s67_s20  ;;  %s51_s25 = int_to_ptr.hbm [resolvable:$true] %s50_s25 }
   0x9   :  { %73 = dma.hbm_to_vmem [thread:$0]  %s66_s16, 1024, %s68_s20, [#allocation9], %s824_s17, %s824_s17, %s825_s18  }
   0xa   :  { %s827_s26 = smov [#allocation2]   ;;  %s828_s5 = smov [#allocation7]  }
   0xb   :  { %s24_s27 = sshll.u32 %s827_s26, 4  ;;  %s52_s28 = sshll.u32 %s828_s5, 4  ;;  %s25_s27 = int_to_ptr.vmem [resolvable:$true] %s24_s27  ;;  %s53_s28 = int_to_ptr.vmem [resolvable:$true] %s52_s28 }
   0xc   :  { %30 = dma.hbm_to_vmem [thread:$0]  %s23_s23, 128, %s25_s27, [#allocation3], %s824_s17, %s824_s17, %s825_s18  }
   0xd   :  { %s80_s10 = sshll.u32 %s920_s7, 4  ;;  %s829_s0 = smov [#allocation10]   ;;  %s81_s10 = int_to_ptr.hbm [resolvable:$true] %s80_s10 }
   0xe   :  { %58 = dma.hbm_to_vmem [thread:$0]  %s51_s25, 1024, %s53_s28, [#allocation6], %s824_s17, %s824_s17, %s825_s18  }
   0xf   :  { %s82_s11 = sshll.u32 %s829_s0, 4  ;;  %s83_s11 = int_to_ptr.vmem [resolvable:$true] %s82_s11 }
  0x10   :  { %88 = dma.hbm_to_vmem [thread:$0]  %s81_s10, 1024, %s83_s11, [#allocation9], %s824_s17, %s824_s17, %s825_s18  }
  0x11   :  { %815 = dma.done.wait [#allocation3], 128  }
  0x12   :  { %816 = vsyncadd [#allocation3], 4294967168 }
  0x13   :  { %817 = dma.done.wait [#allocation6], 2048  }
  0x14   :  { %818 = vsyncadd [#allocation6], 4294965248 }
  0x15   :  { %819 = dma.done.wait [#allocation9], 2048  }
  0x16   :  { %820 = vsyncadd [#allocation9], 4294965248  ;;  %v648_v0 = vld [vmem:[#allocation8 + $0x38] sm:$0xff]  ;;  %v647_v2 = vld [vmem:[#allocation8 + $0x30] sm:$0xff]  ;;  %s830_s16 = smov [#allocation11]   ;;  %s477_s19 = sshll.u32 %s922_s9, 4  ;;  %s478_s19 = int_to_ptr.hbm [resolvable:$true] %s477_s19 }
  0x17   :  { %v632_v1 = vld [vmem:[#allocation5 + $0x38] sm:$0xff]  ;;  %351 = vmatpush.bf16.msra.mxu2 %v648_v0  ;;  %v631_v3 = vld [vmem:[#allocation5 + $0x30] sm:$0xff]  ;;  %v646_v5 = vld [vmem:[#allocation8 + $0x28] sm:$0xff]  ;;  %s475_s17 = sshll.u32 %s830_s16, 4  ;;  %s832_s20 = smov 8   ;;  %s476_s17 = int_to_ptr.vmem [resolvable:$true] %s475_s17 }
  0x18   :  { %186 = vmatpush.bf16.msra.mxu0 %v632_v1  ;;  %v640_v4 = vld [vmem:[#allocation7 + $0x38] sm:$0xff]  ;;  %v630_v6 = vld [vmem:[#allocation5 + $0x28] sm:$0xff]  ;;  %v639_v7 = vld [vmem:[#allocation7 + $0x30] sm:$0xff] }
  0x19   :  { %270 = vmatpush.bf16.msra.mxu1 %v640_v4  ;;  %v645_v8 = vld [vmem:[#allocation8 + $0x20] sm:$0xff]  ;;  %v638_v10 = vld [vmem:[#allocation7 + $0x28] sm:$0xff]  ;;  %v644_v11 = vld [vmem:[#allocation8 + $0x18] sm:$0xff] }
  0x1a   :  { %v629_v9 = vld [vmem:[#allocation5 + $0x20] sm:$0xff]  ;;  %v628_v12 = vld [vmem:[#allocation5 + $0x18] sm:$0xff]  ;;  %v643_v13 = vld [vmem:[#allocation8 + $0x10] sm:$0xff] }
  0x1b   :  { %352 = vmatpush.bf16.msra.mxu2 %v647_v2  ;;  %v627_v14 = vld [vmem:[#allocation5 + $0x10] sm:$0xff]  ;;  %v642_v15 = vld [vmem:[#allocation8 + $0x8] sm:$0xff]  ;;  %v641_v17 = vld [vmem:[#allocation8] sm:$0xff] }
  0x1c   :  { %187 = vmatpush.bf16.msra.mxu0 %v631_v3  ;;  %v626_v16 = vld [vmem:[#allocation5 + $0x8] sm:$0xff]  ;;  %v625_v18 = vld [vmem:[#allocation5] sm:$0xff]  ;;  %v624_v19 = vld [vmem:[#allocation2] sm:$0xff] }
  0x1d   :  { %271 = vmatpush.bf16.msra.mxu1 %v639_v7  ;;  %v637_v20 = vld [vmem:[#allocation7 + $0x20] sm:$0xff]  ;;  %v656_v21 = vld [vmem:[#allocation10 + $0x38] sm:$0xff]  ;;  %v655_v23 = vld [vmem:[#allocation10 + $0x30] sm:$0xff] }
  0x1e   :  { %451 = vmatpush.bf16.msra.mxu3 %v656_v21  ;;  %v636_v22 = vld [vmem:[#allocation7 + $0x18] sm:$0xff]  ;;  %v635_v24 = vld [vmem:[#allocation7 + $0x10] sm:$0xff]  ;;  %v654_v25 = vld [vmem:[#allocation10 + $0x28] sm:$0xff] }
  0x1f   :  { %353 = vmatpush.bf16.msra.mxu2 %v646_v5  ;;  %v634_v26 = vld [vmem:[#allocation7 + $0x8] sm:$0xff]  ;;  %v653_v27 = vld [vmem:[#allocation10 + $0x20] sm:$0xff]  ;;  %v652_v29 = vld [vmem:[#allocation10 + $0x18] sm:$0xff] }
  0x20   :  { %188 = vmatpush.bf16.msra.mxu0 %v630_v6  ;;  %v633_v28 = vld [vmem:[#allocation7] sm:$0xff]  ;;  %v651_v30 = vld [vmem:[#allocation10 + $0x10] sm:$0xff]  ;;  %v129_v31 = vld [vmem:[%s915_s2] sm:$0x1] }
  0x21   :  { %272 = vmatpush.bf16.msra.mxu1 %v638_v10  ;;  %v300_v32 = vld [vmem:[%s919_s6] sm:$0x1]  ;;  %v650_v33 = vld [vmem:[#allocation10 + $0x8] sm:$0xff]  ;;  %v130_v34 = vunpack.c.l.bf16 %v129_v31  ;;  %v649_v37 = vld [vmem:[#allocation10] sm:$0xff] }
  0x22   :  { %452 = vmatpush.bf16.msra.mxu3 %v655_v23  ;;  %v301_v35 = vunpack.c.l.bf16 %v300_v32  ;;  %v219_v5 = vld [vmem:[%s917_s4] sm:$0x1] }
  0x23   :  { %354 = vmatpush.bf16.msra.mxu2 %v645_v8  ;;  %v131_v38 = vperm.slane %v130_v34, 0  ;;  %v220_v6 = vunpack.c.l.bf16 %v219_v5  ;;  %v400_v7 = vld [vmem:[%s921_s8] sm:$0x1]  ;;  %s831_s8 = smov 128  }
  0x24   :  { %189 = vmatpush.bf16.msra.mxu0 %v629_v9  ;;  %v302_v39 = vperm.slane %v301_v35, 0  ;;  %v401_v10 = vunpack.c.l.bf16 %v400_v7 }
  0x25   :  { %273 = vmatpush.bf16.msra.mxu1 %v637_v20  ;;  %v221_v9 = vperm.slane %v220_v6, 0 }
  0x26   :  { %453 = vmatpush.bf16.msra.mxu3 %v654_v25 }
  0x27   :  { %355 = vmatpush.bf16.msra.mxu2 %v644_v11 }
  0x28   :  { %190 = vmatpush.bf16.msra.mxu0 %v628_v12  ;;  %v402_v12 = vperm.slane %v401_v10, 0 }
  0x29   :  { %274 = vmatpush.bf16.msra.mxu1 %v636_v22 }
  0x2a   :  { %454 = vmatpush.bf16.msra.mxu3 %v653_v27 }
  0x2b   :  { %356 = vmatpush.bf16.msra.mxu2 %v643_v13 }
  0x2c   :  { %191 = vmatpush.bf16.msra.mxu0 %v627_v14 }
  0x2d   :  { %275 = vmatpush.bf16.msra.mxu1 %v635_v24 }
  0x2e   :  { %455 = vmatpush.bf16.msra.mxu3 %v652_v29 }
  0x2f   :  { %357 = vmatpush.bf16.msra.mxu2 %v642_v15 }
  0x30   :  { %192 = vmatpush.bf16.msra.mxu0 %v626_v16 }
  0x31   :  { %276 = vmatpush.bf16.msra.mxu1 %v634_v26 }
  0x32   :  { %456 = vmatpush.bf16.msra.mxu3 %v651_v30 }
  0x33   :  { %358 = vmatpush.bf16.msra.mxu2 %v641_v17 }
  0x34   :  { %193 = vmatpush.bf16.msra.mxu0 %v625_v18 }
  0x35   :  { %277 = vmatpush.bf16.msra.mxu1 %v633_v28 }
  0x36   :  { %359 = vmatmul.bf16.vlgmr.msra.gmra.mxu2 %v624_v19  ;;  %457 = vmatpush.bf16.msra.mxu3 %v650_v33 }
  0x37   :  { %194 = vmatmul.bf16.vlgmr.msra.gmra.mxu0 %v624_v19 }
  0x3a   :  { %458 = vmatpush.bf16.msra.mxu3 %v649_v37 }
  0xb4   :  { %v195_v36 = vpop.f32.mrf.mxu0 }
  0xb5   :  { %v196_v41 = vadd.f32 %v195_v36, %v131_v38 }
  0xb7   :  { %v200_v45 = vmax.f32 %v196_v41, 0.0 }
  0xb9   :  { %v360_v40 = vpop.f32.mrf.mxu2 }
  0xba   :  { %v361_v42 = vadd.f32 %v360_v40, %v302_v39 }
  0xbc   :  { %v367_v43 = vmul.f32 0.044715, %v361_v42  ;;  %v197_v44 = vpop.f32.mrf.mxu0  ;;  %v365_v63 = vmul.f32 0.5, %v361_v42 }
  0xbd   :  { %v198_v46 = vadd.f32 %v197_v44, %v131_v38 }
  0xbe   :  { %v369_v47 = vmul.f32 %v367_v43, %v361_v42 }
  0xbf   :  { %v201_v48 = vmax.f32 %v198_v46, 0.0 }
  0xc0   :  { %v371_v49 = vmul.f32 %v369_v47, %v361_v42 }
  0xc1   :  { %v362_v50 = vpop.f32.mrf.mxu2  ;;  %v202_v51 = vpack.c.bf16 %v201_v48, %v200_v45 }
  0xc2   :  { %v363_v52 = vadd.f32 %v362_v50, %v302_v39  ;;  %v373_v53 = vadd.f32 %v371_v49, %v361_v42 }
  0xc3   :  { %278 = vmatmul.bf16.vlgmr.msra.gmra.mxu1 %v202_v51 }
  0xc4   :  { %v368_v54 = vmul.f32 0.044715, %v363_v52  ;;  %v375_v56 = vmul.f32 0.7978846, %v373_v53  ;;  %v366_v0 = vmul.f32 0.5, %v363_v52 }
  0xc6   :  { %v370_v55 = vmul.f32 %v368_v54, %v363_v52  ;;  %667 = vtanh.f32 %v375_v56 }
  0xc8   :  { %v372_v57 = vmul.f32 %v370_v55, %v363_v52 }
  0xca   :  { %v374_v58 = vadd.f32 %v372_v57, %v363_v52 }
  0xcc   :  { %v376_v59 = vmul.f32 0.7978846, %v374_v58  ;;  %v668_v60 = vpop.eup %667 }
  0xcd   :  { %v379_v61 = vadd.f32 1.0, %v668_v60 }
  0xce   :  { %669 = vtanh.f32 %v376_v59 }
  0xcf   :  { %v381_v2 = vmul.f32 %v379_v61, %v365_v63 }
  0xd4   :  { %v670_v62 = vpop.eup %669 }
  0xd5   :  { %v380_v1 = vadd.f32 1.0, %v670_v62 }
  0xd7   :  { %v382_v3 = vmul.f32 %v380_v1, %v366_v0 }
  0xd9   :  { %v383_v4 = vpack.c.bf16 %v382_v3, %v381_v2 }
  0xdb   :  { %459 = vmatmul.bf16.vlgmr.msra.gmra.mxu3 %v383_v4 }
 0x140   :  { %v279_v8 = vpop.f32.mrf.mxu1 }
 0x141   :  { %v280_v11 = vadd.f32 %v279_v8, %v221_v9 }
 0x143   :  { %v465_v14 = vmul.f32 0.1, %v280_v11 }
 0x148   :  { %v281_v16 = vpop.f32.mrf.mxu1 }
 0x149   :  { %v282_v18 = vadd.f32 %v281_v16, %v221_v9 }
 0x14b   :  { %v466_v20 = vmul.f32 0.1, %v282_v18 }
 0x15e   :  { %v460_v13 = vpop.f32.mrf.mxu3 }
 0x15f   :  { %v461_v15 = vadd.f32 %v460_v13, %v402_v12 }
 0x161   :  { %v467_v17 = vadd.f32 %v465_v14, %v461_v15 }
 0x163   :  { %469 = vst [vmem:[#allocation11] sm:$0xff] %v467_v17 }
 0x166   :  { %v462_v19 = vpop.f32.mrf.mxu3 }
 0x167   :  { %v463_v21 = vadd.f32 %v462_v19, %v402_v12 }
 0x169   :  { %v468_v22 = vadd.f32 %v466_v20, %v463_v21 }
 0x16b   :  { %470 = vst [vmem:[#allocation11 + $0x8] sm:$0xff] %v468_v22 }
 0x16c   :  { %483 = dma.vmem_to_hbm [thread:$0]  %s476_s17, 256, %s478_s19, [#allocation4], %s831_s8, %s831_s8, %s832_s20  }
 0x16d   :  { %821 = dma.done.wait [#allocation4], 256  }
 0x16e   :  { %822 = vsyncadd [#allocation4], 4294967040 }
 0x16f   :  { %488 = vsyncpa [#allocation3], 1 }
 0x170   :  { %489 = vsyncpa [#allocation6], 1 }
 0x171   :  { %490 = vsyncpa [#allocation9], 1 }
 0x172   :  { %491 = vsyncpa [#allocation4], 1 }

// kernel: tpu_custom_call.1
= control target key start
LH: loop header
LB: loop body
LE: loop exit
PB: predicated region body
PF: predicated region fallthrough
CT: control target
= control target key end

     0   :  { %14 = vsyncpa [#allocation3], 0  ;;  %s913_s0 = inlined_call_operand.hbm [shape: bf16[16,128], index: 0, kind: input, shape index: {}]   ;;  %s914_s1 = inlined_call_operand.hbm [shape: bf16[128,128], index: 1, kind: input, shape index: {}]   ;;  %s915_s2 = inlined_call_operand.vmem [shape: bf16[1,128], index: 2, kind: input, shape index: {}]   ;;  %s916_s3 = inlined_call_operand.hbm [shape: bf16[128,128], index: 3, kind: input, shape index: {}]   ;;  %s917_s4 = inlined_call_operand.vmem [shape: bf16[1,128], index: 4, kind: input, shape index: {}]   ;;  %s918_s5 = inlined_call_operand.hbm [shape: bf16[128,128], index: 5, kind: input, shape index: {}]   ;;  %s919_s6 = inlined_call_operand.vmem [shape: bf16[1,128], index: 6, kind: input, shape index: {}]   ;;  %s920_s7 = inlined_call_operand.hbm [shape: bf16[128,128], index: 7, kind: input, shape index: {}]   ;;  %s921_s8 = inlined_call_operand.vmem [shape: bf16[1,128], index: 8, kind: input, shape index: {}]   ;;  %s922_s9 = inlined_call_operand.hbm [shape: f32[16,128], index: 9, kind: output, shape index: {}]  }
   0x1   :  { %15 = vsyncpa [#allocation6], 0 }
   0x2   :  { %16 = vsyncpa [#allocation9], 0 }
   0x3   :  { %17 = vsyncpa [#allocation4], 0  ;;  %s35_s11 = sshll.u32 %s914_s1, 4  ;;  %s823_s12 = smov [#allocation5]   ;;  %s36_s11 = int_to_ptr.hbm [resolvable:$true] %s35_s11 }
   0x4   :  { %s37_s13 = sshll.u32 %s823_s12, 4  ;;  %s65_s16 = sshll.u32 %s918_s5, 4  ;;  %s38_s13 = int_to_ptr.vmem [resolvable:$true] %s37_s13  ;;  %s66_s16 = int_to_ptr.hbm [resolvable:$true] %s65_s16 }
   0x5   :  { %s824_s17 = smov 64   ;;  %s825_s18 = smov 4  }
   0x6   :  { %43 = dma.hbm_to_vmem [thread:$0]  %s36_s11, 1024, %s38_s13, [#allocation6], %s824_s17, %s824_s17, %s825_s18  }
   0x7   :  { %s826_s19 = smov [#allocation8]   ;;  %s22_s23 = sshll.u32 %s913_s0, 4  ;;  %s23_s23 = int_to_ptr.hbm [resolvable:$true] %s22_s23 }
   0x8   :  { %s67_s20 = sshll.u32 %s826_s19, 4  ;;  %s50_s25 = sshll.u32 %s916_s3, 4  ;;  %s68_s20 = int_to_ptr.vmem [resolvable:$true] %s67_s20  ;;  %s51_s25 = int_to_ptr.hbm [resolvable:$true] %s50_s25 }
   0x9   :  { %73 = dma.hbm_to_vmem [thread:$0]  %s66_s16, 1024, %s68_s20, [#allocation9], %s824_s17, %s824_s17, %s825_s18  }
   0xa   :  { %s827_s26 = smov [#allocation2]   ;;  %s828_s5 = smov [#allocation7]  }
   0xb   :  { %s24_s27 = sshll.u32 %s827_s26, 4  ;;  %s52_s28 = sshll.u32 %s828_s5, 4  ;;  %s25_s27 = int_to_ptr.vmem [resolvable:$true] %s24_s27  ;;  %s53_s28 = int_to_ptr.vmem [resolvable:$true] %s52_s28 }
   0xc   :  { %30 = dma.hbm_to_vmem [thread:$0]  %s23_s23, 128, %s25_s27, [#allocation3], %s824_s17, %s824_s17, %s825_s18  }
   0xd   :  { %s80_s10 = sshll.u32 %s920_s7, 4  ;;  %s829_s0 = smov [#allocation10]   ;;  %s81_s10 = int_to_ptr.hbm [resolvable:$true] %s80_s10 }
   0xe   :  { %58 = dma.hbm_to_vmem [thread:$0]  %s51_s25, 1024, %s53_s28, [#allocation6], %s824_s17, %s824_s17, %s825_s18  }
   0xf   :  { %s82_s11 = sshll.u32 %s829_s0, 4  ;;  %s83_s11 = int_to_ptr.vmem [resolvable:$true] %s82_s11 }
  0x10   :  { %88 = dma.hbm_to_vmem [thread:$0]  %s81_s10, 1024, %s83_s11, [#allocation9], %s824_s17, %s824_s17, %s825_s18  }
  0x11   :  { %815 = dma.done.wait [#allocation3], 128  }
  0x12   :  { %816 = vsyncadd [#allocation3], 4294967168 }
  0x13   :  { %817 = dma.done.wait [#allocation6], 2048  }
  0x14   :  { %818 = vsyncadd [#allocation6], 4294965248 }
  0x15   :  { %819 = dma.done.wait [#allocation9], 2048  }
  0x16   :  { %820 = vsyncadd [#allocation9], 4294965248  ;;  %v648_v0 = vld [vmem:[#allocation8 + $0x38] sm:$0xff]  ;;  %v647_v2 = vld [vmem:[#allocation8 + $0x30] sm:$0xff]  ;;  %s830_s16 = smov [#allocation11]   ;;  %s477_s19 = sshll.u32 %s922_s9, 4  ;;  %s478_s19 = int_to_ptr.hbm [resolvable:$true] %s477_s19 }
  0x17   :  { %v632_v1 = vld [vmem:[#allocation5 + $0x38] sm:$0xff]  ;;  %351 = vmatpush.bf16.msra.mxu2 %v648_v0  ;;  %v631_v3 = vld [vmem:[#allocation5 + $0x30] sm:$0xff]  ;;  %v646_v5 = vld [vmem:[#allocation8 + $0x28] sm:$0xff]  ;;  %s475_s17 = sshll.u32 %s830_s16, 4  ;;  %s832_s20 = smov 8   ;;  %s476_s17 = int_to_ptr.vmem [resolvable:$true] %s475_s17 }
  0x18   :  { %186 = vmatpush.bf16.msra.mxu0 %v632_v1  ;;  %v640_v4 = vld [vmem:[#allocation7 + $0x38] sm:$0xff]  ;;  %v630_v6 = vld [vmem:[#allocation5 + $0x28] sm:$0xff]  ;;  %v639_v7 = vld [vmem:[#allocation7 + $0x30] sm:$0xff] }
  0x19   :  { %270 = vmatpush.bf16.msra.mxu1 %v640_v4  ;;  %v645_v8 = vld [vmem:[#allocation8 + $0x20] sm:$0xff]  ;;  %v638_v10 = vld [vmem:[#allocation7 + $0x28] sm:$0xff]  ;;  %v644_v11 = vld [vmem:[#allocation8 + $0x18] sm:$0xff] }
  0x1a   :  { %v629_v9 = vld [vmem:[#allocation5 + $0x20] sm:$0xff]  ;;  %v628_v12 = vld [vmem:[#allocation5 + $0x18] sm:$0xff]  ;;  %v643_v13 = vld [vmem:[#allocation8 + $0x10] sm:$0xff] }
  0x1b   :  { %352 = vmatpush.bf16.msra.mxu2 %v647_v2  ;;  %v627_v14 = vld [vmem:[#allocation5 + $0x10] sm:$0xff]  ;;  %v642_v15 = vld [vmem:[#allocation8 + $0x8] sm:$0xff]  ;;  %v641_v17 = vld [vmem:[#allocation8] sm:$0xff] }
  0x1c   :  { %187 = vmatpush.bf16.msra.mxu0 %v631_v3  ;;  %v626_v16 = vld [vmem:[#allocation5 + $0x8] sm:$0xff]  ;;  %v625_v18 = vld [vmem:[#allocation5] sm:$0xff]  ;;  %v624_v19 = vld [vmem:[#allocation2] sm:$0xff] }
  0x1d   :  { %271 = vmatpush.bf16.msra.mxu1 %v639_v7  ;;  %v637_v20 = vld [vmem:[#allocation7 + $0x20] sm:$0xff]  ;;  %v656_v21 = vld [vmem:[#allocation10 + $0x38] sm:$0xff]  ;;  %v655_v23 = vld [vmem:[#allocation10 + $0x30] sm:$0xff] }
  0x1e   :  { %451 = vmatpush.bf16.msra.mxu3 %v656_v21  ;;  %v636_v22 = vld [vmem:[#allocation7 + $0x18] sm:$0xff]  ;;  %v635_v24 = vld [vmem:[#allocation7 + $0x10] sm:$0xff]  ;;  %v654_v25 = vld [vmem:[#allocation10 + $0x28] sm:$0xff] }
  0x1f   :  { %353 = vmatpush.bf16.msra.mxu2 %v646_v5  ;;  %v634_v26 = vld [vmem:[#allocation7 + $0x8] sm:$0xff]  ;;  %v653_v27 = vld [vmem:[#allocation10 + $0x20] sm:$0xff]  ;;  %v652_v29 = vld [vmem:[#allocation10 + $0x18] sm:$0xff] }
  0x20   :  { %188 = vmatpush.bf16.msra.mxu0 %v630_v6  ;;  %v633_v28 = vld [vmem:[#allocation7] sm:$0xff]  ;;  %v651_v30 = vld [vmem:[#allocation10 + $0x10] sm:$0xff]  ;;  %v129_v31 = vld [vmem:[%s915_s2] sm:$0x1] }
  0x21   :  { %272 = vmatpush.bf16.msra.mxu1 %v638_v10  ;;  %v300_v32 = vld [vmem:[%s919_s6] sm:$0x1]  ;;  %v650_v33 = vld [vmem:[#allocation10 + $0x8] sm:$0xff]  ;;  %v130_v34 = vunpack.c.l.bf16 %v129_v31  ;;  %v649_v37 = vld [vmem:[#allocation10] sm:$0xff] }
  0x22   :  { %452 = vmatpush.bf16.msra.mxu3 %v655_v23  ;;  %v301_v35 = vunpack.c.l.bf16 %v300_v32  ;;  %v219_v5 = vld [vmem:[%s917_s4] sm:$0x1] }
  0x23   :  { %354 = vmatpush.bf16.msra.mxu2 %v645_v8  ;;  %v131_v38 = vperm.slane %v130_v34, 0  ;;  %v220_v6 = vunpack.c.l.bf16 %v219_v5  ;;  %v400_v7 = vld [vmem:[%s921_s8] sm:$0x1]  ;;  %s831_s8 = smov 128  }
  0x24   :  { %189 = vmatpush.bf16.msra.mxu0 %v629_v9  ;;  %v302_v39 = vperm.slane %v301_v35, 0  ;;  %v401_v10 = vunpack.c.l.bf16 %v400_v7 }
  0x25   :  { %273 = vmatpush.bf16.msra.mxu1 %v637_v20  ;;  %v221_v9 = vperm.slane %v220_v6, 0 }
  0x26   :  { %453 = vmatpush.bf16.msra.mxu3 %v654_v25 }
  0x27   :  { %355 = vmatpush.bf16.msra.mxu2 %v644_v11 }
  0x28   :  { %190 = vmatpush.bf16.msra.mxu0 %v628_v12  ;;  %v402_v12 = vperm.slane %v401_v10, 0 }
  0x29   :  { %274 = vmatpush.bf16.msra.mxu1 %v636_v22 }
  0x2a   :  { %454 = vmatpush.bf16.msra.mxu3 %v653_v27 }
  0x2b   :  { %356 = vmatpush.bf16.msra.mxu2 %v643_v13 }
  0x2c   :  { %191 = vmatpush.bf16.msra.mxu0 %v627_v14 }
  0x2d   :  { %275 = vmatpush.bf16.msra.mxu1 %v635_v24 }
  0x2e   :  { %455 = vmatpush.bf16.msra.mxu3 %v652_v29 }
  0x2f   :  { %357 = vmatpush.bf16.msra.mxu2 %v642_v15 }
  0x30   :  { %192 = vmatpush.bf16.msra.mxu0 %v626_v16 }
  0x31   :  { %276 = vmatpush.bf16.msra.mxu1 %v634_v26 }
  0x32   :  { %456 = vmatpush.bf16.msra.mxu3 %v651_v30 }
  0x33   :  { %358 = vmatpush.bf16.msra.mxu2 %v641_v17 }
  0x34   :  { %193 = vmatpush.bf16.msra.mxu0 %v625_v18 }
  0x35   :  { %277 = vmatpush.bf16.msra.mxu1 %v633_v28 }
  0x36   :  { %359 = vmatmul.bf16.vlgmr.msra.gmra.mxu2 %v624_v19  ;;  %457 = vmatpush.bf16.msra.mxu3 %v650_v33 }
  0x37   :  { %194 = vmatmul.bf16.vlgmr.msra.gmra.mxu0 %v624_v19 }
  0x3a   :  { %458 = vmatpush.bf16.msra.mxu3 %v649_v37 }
  0xb4   :  { %v195_v36 = vpop.f32.mrf.mxu0 }
  0xb5   :  { %v196_v41 = vadd.f32 %v195_v36, %v131_v38 }
  0xb7   :  { %v200_v45 = vmax.f32 %v196_v41, 0.0 }
  0xb9   :  { %v360_v40 = vpop.f32.mrf.mxu2 }
  0xba   :  { %v361_v42 = vadd.f32 %v360_v40, %v302_v39 }
  0xbc   :  { %v367_v43 = vmul.f32 0.044715, %v361_v42  ;;  %v197_v44 = vpop.f32.mrf.mxu0  ;;  %v365_v63 = vmul.f32 0.5, %v361_v42 }
  0xbd   :  { %v198_v46 = vadd.f32 %v197_v44, %v131_v38 }
  0xbe   :  { %v369_v47 = vmul.f32 %v367_v43, %v361_v42 }
  0xbf   :  { %v201_v48 = vmax.f32 %v198_v46, 0.0 }
  0xc0   :  { %v371_v49 = vmul.f32 %v369_v47, %v361_v42 }
  0xc1   :  { %v362_v50 = vpop.f32.mrf.mxu2  ;;  %v202_v51 = vpack.c.bf16 %v201_v48, %v200_v45 }
  0xc2   :  { %v363_v52 = vadd.f32 %v362_v50, %v302_v39  ;;  %v373_v53 = vadd.f32 %v371_v49, %v361_v42 }
  0xc3   :  { %278 = vmatmul.bf16.vlgmr.msra.gmra.mxu1 %v202_v51 }
  0xc4   :  { %v368_v54 = vmul.f32 0.044715, %v363_v52  ;;  %v375_v56 = vmul.f32 0.7978846, %v373_v53  ;;  %v366_v0 = vmul.f32 0.5, %v363_v52 }
  0xc6   :  { %v370_v55 = vmul.f32 %v368_v54, %v363_v52  ;;  %667 = vtanh.f32 %v375_v56 }
  0xc8   :  { %v372_v57 = vmul.f32 %v370_v55, %v363_v52 }
  0xca   :  { %v374_v58 = vadd.f32 %v372_v57, %v363_v52 }
  0xcc   :  { %v376_v59 = vmul.f32 0.7978846, %v374_v58  ;;  %v668_v60 = vpop.eup %667 }
  0xcd   :  { %v379_v61 = vadd.f32 1.0, %v668_v60 }
  0xce   :  { %669 = vtanh.f32 %v376_v59 }
  0xcf   :  { %v381_v2 = vmul.f32 %v379_v61, %v365_v63 }
  0xd4   :  { %v670_v62 = vpop.eup %669 }
  0xd5   :  { %v380_v1 = vadd.f32 1.0, %v670_v62 }
  0xd7   :  { %v382_v3 = vmul.f32 %v380_v1, %v366_v0 }
  0xd9   :  { %v383_v4 = vpack.c.bf16 %v382_v3, %v381_v2 }
  0xdb   :  { %459 = vmatmul.bf16.vlgmr.msra.gmra.mxu3 %v383_v4 }
 0x140   :  { %v279_v8 = vpop.f32.mrf.mxu1 }
 0x141   :  { %v280_v11 = vadd.f32 %v279_v8, %v221_v9 }
 0x143   :  { %v465_v14 = vmul.f32 0.1, %v280_v11 }
 0x148   :  { %v281_v16 = vpop.f32.mrf.mxu1 }
 0x149   :  { %v282_v18 = vadd.f32 %v281_v16, %v221_v9 }
 0x14b   :  { %v466_v20 = vmul.f32 0.1, %v282_v18 }
 0x15e   :  { %v460_v13 = vpop.f32.mrf.mxu3 }
 0x15f   :  { %v461_v15 = vadd.f32 %v460_v13, %v402_v12 }
 0x161   :  { %v467_v17 = vadd.f32 %v465_v14, %v461_v15 }
 0x163   :  { %469 = vst [vmem:[#allocation11] sm:$0xff] %v467_v17 }
 0x166   :  { %v462_v19 = vpop.f32.mrf.mxu3 }
 0x167   :  { %v463_v21 = vadd.f32 %v462_v19, %v402_v12 }
 0x169   :  { %v468_v22 = vadd.f32 %v466_v20, %v463_v21 }
 0x16b   :  { %470 = vst [vmem:[#allocation11 + $0x8] sm:$0xff] %v468_v22 }
 0x16c   :  { %483 = dma.vmem_to_hbm [thread:$0]  %s476_s17, 256, %s478_s19, [#allocation4], %s831_s8, %s831_s8, %s832_s20  }
 0x16d   :  { %821 = dma.done.wait [#allocation4], 256  }
 0x16e   :  { %822 = vsyncadd [#allocation4], 4294967040 }
 0x16f   :  { %488 = vsyncpa [#allocation3], 1 }
 0x170   :  { %489 = vsyncpa [#allocation6], 1 }
 0x171   :  { %490 = vsyncpa [#allocation9], 1 }
 0x172   :  { %491 = vsyncpa [#allocation4], 1 }

</bundles_post_ra>
